<compile_context>
chip_gen: v5e
topology: v5e:2x2
jax: 0.10.0
libtpu: 0.0.40
codegen_flags: <defaults>
</compile_context>

<pallas_src>
import jax
import jax.numpy as jnp
from jax.experimental import pallas as pl
from jax.experimental.pallas import tpu as pltpu

_MiB = 1024 * 1024
_SUBLANES = 8
_SINGLE_BLOCK_MAX_BYTES = 1 * _MiB      # below this, pipelining does not pay
_MIN_BLOCK_BYTES = 512 * 1024


def _weighted_tanh_kernel(scale_ref, x_ref, o_ref):
    # scale_ref: (1, 1) f32 in SMEM; x_ref / o_ref: (tile_rows, wide) in VMEM.
    # Compute in f32: HBM-bound, so f32 math is free; matches PyTorch's
    # fp32-parameter promotion and dodges v5e's missing bf16 VPU/EUP.
    x_f32 = x_ref[...].astype(jnp.float32)
    o_ref[...] = (scale_ref[0, 0] * jnp.tanh(x_f32)).astype(o_ref.dtype)


def _generation_tuning():
    """(target_block_bytes, vmem_limit_bytes) for the current TPU generation."""
    target_block = 4 * _MiB          # v5e/v6e: already ~85% of HBM roofline
    vmem_limit = 32 * _MiB           # v5e scoped default is only 16 MiB
    try:
        info = pltpu.get_tpu_info()
        vmem_cap = int(getattr(info, "vmem_capacity_bytes", 128 * _MiB))
    except Exception:
        vmem_cap = 128 * _MiB
    if vmem_cap <= 64 * _MiB:
        # v7x-like: 64 MiB VMEM/TC, ~3.2 TB/s HBM -> bigger steps amortize the
        # ~0.35 us per-step overhead. 2 bufs x (in + out) x 8 MiB = 32 MiB.
        target_block = 8 * _MiB
        vmem_limit = min(48 * _MiB, (vmem_cap * 3) // 4)
    return target_block, vmem_limit


def _choose_tiling(rows, bytes_per_row, target_block):
    """Pick (tile_rows, grid_steps) for the single grid axis."""
    total_bytes = rows * bytes_per_row
    if total_bytes <= _SINGLE_BLOCK_MAX_BYTES:
        return rows, 1                       # tiny array: one block is fine
    # Aim for >= 8 steps (pipelining + both v7x TensorCores), block bytes
    # clamped to [_MIN_BLOCK_BYTES, target_block], tile_rows a multiple of 8.
    tile_bytes = min(target_block, max(_MIN_BLOCK_BYTES, total_bytes // 8))
    tile_rows = max(_SUBLANES,
                    (tile_bytes // bytes_per_row) // _SUBLANES * _SUBLANES)
    tile_rows = min(tile_rows, rows)
    steps = pl.cdiv(rows, tile_rows)
    if steps > 1 and steps % 2 == 1:
        # Prefer an even step count so v7x's two TensorCores split evenly.
        alt_rows = max(_SUBLANES,
                       pl.cdiv(rows, (steps + 1) * _SUBLANES) * _SUBLANES)
        if pl.cdiv(rows, alt_rows) % 2 == 0:
            tile_rows = alt_rows
            steps = pl.cdiv(rows, tile_rows)
    return tile_rows, steps


def _weighted_tanh_2d(x2d, scale_smem, out_dtype):
    rows, wide = x2d.shape
    bytes_per_row = wide * x2d.dtype.itemsize
    target_block, vmem_limit = _generation_tuning()
    tile_rows, steps = _choose_tiling(rows, bytes_per_row, target_block)

    n_elems = rows * wide
    cost = pl.CostEstimate(
        flops=n_elems,                 # one multiply per element
        transcendentals=n_elems,       # one tanh per element
        bytes_accessed=n_elems * (x2d.dtype.itemsize
                                  + jnp.dtype(out_dtype).itemsize),
    )

    return pl.pallas_call(
        _weighted_tanh_kernel,
        out_shape=jax.ShapeDtypeStruct((rows, wide), out_dtype),
        grid=(steps,),
        in_specs=[
            pl.BlockSpec(memory_space=pltpu.SMEM),             # scalar scale
            pl.BlockSpec((tile_rows, wide), lambda i: (i, 0)),
        ],
        out_specs=pl.BlockSpec((tile_rows, wide), lambda i: (i, 0)),
        compiler_params=pltpu.CompilerParams(
            dimension_semantics=("parallel",),
            vmem_limit_bytes=vmem_limit,
        ),
        cost_estimate=cost,
    )(scale_smem, x2d)


def weighted_tanh(x: jax.Array, scale_weight) -> jax.Array:
    """Elementwise scale_weight * tanh(x) on TPU via Pallas. Any shape."""
    orig_shape = x.shape
    scale_f32 = jnp.asarray(scale_weight, dtype=jnp.float32).reshape(-1)[0]
    scale_smem = scale_f32.reshape(1, 1)
    # PyTorch promotes (fp32 parameter * tanh(x)); mirror that promotion.
    out_dtype = jnp.promote_types(x.dtype, jnp.result_type(scale_weight))

    n = x.size
    if n == 0:
        return jnp.zeros(orig_shape, dtype=out_dtype)

    x_flat = jnp.ravel(x)

    # Widest lane-dense last dim that divides n exactly (reshape is free).
    wide = None
    for cand in (2048, 1024, 512, 256, 128):
        if n % cand == 0:
            wide = cand
            break

    if wide is not None:
        out2d = _weighted_tanh_2d(x_flat.reshape(n // wide, wide),
                                  scale_smem, out_dtype)
        return out2d.reshape(orig_shape)

    # Ragged path (n % 128 != 0): kernel on the 128-aligned prefix, plain jnp
    # on the <128-element tail. Avoids the extra full-array pad/concatenate
    # of the input that the old fallback did.
    wide = 128
    n_main = (n // wide) * wide
    tail = x_flat[n_main:]
    tail_out = (scale_f32 * jnp.tanh(tail.astype(jnp.float32))).astype(out_dtype)
    if n_main == 0:
        return tail_out.reshape(orig_shape)
    main_out = _weighted_tanh_2d(x_flat[:n_main].reshape(n_main // wide, wide),
                                 scale_smem, out_dtype)
    # TODO(synk): a scalar-prefetched masked store could fold the tail into the
    # kernel and drop this concatenate's extra output pass.
    return jnp.concatenate([main_out.reshape(n_main), tail_out]).reshape(orig_shape)


if __name__ == "__main__":
    key = jax.random.PRNGKey(0)

    # Deterministic parameter init: matches nn.Parameter(torch.ones(1)).
    scale_weight = jnp.ones((1,), dtype=jnp.float32)

    def _ref(x):
        return (scale_weight[0] * jnp.tanh(x.astype(jnp.float32))).astype(
            jnp.promote_types(x.dtype, scale_weight.dtype))

    # 1) Conv-activation-like NCHW input (single-block, no-pad path).
    x = jax.random.normal(key, (2, 4, 16, 16), dtype=jnp.float32)
    out = jax.block_until_ready(weighted_tanh(x, scale_weight))
    assert out.shape == x.shape and out.dtype == x.dtype
    assert jnp.allclose(out, _ref(x), atol=1e-6, rtol=1e-6)

    # 2) Mid-sized input (exercises the multi-step pipelined grid).
    x1 = jax.random.normal(jax.random.PRNGKey(1), (512, 1024), dtype=jnp.float32)
    out1 = jax.block_until_ready(weighted_tanh(x1, scale_weight))
    assert out1.shape == x1.shape and out1.dtype == x1.dtype
    assert jnp.allclose(out1, _ref(x1), atol=1e-6, rtol=1e-6)

    # 3) Ragged count with a 128-aligned prefix (kernel prefix + jnp tail).
    x2 = jax.random.normal(jax.random.PRNGKey(2), (17, 131), dtype=jnp.float32)
    out2 = jax.block_until_ready(weighted_tanh(x2, scale_weight))
    assert out2.shape == x2.shape and out2.dtype == x2.dtype
    assert jnp.allclose(out2, _ref(x2), atol=1e-6, rtol=1e-6)

    # 4) Tiny ragged count (< 128 elements: pure jnp tail path).
    x3 = jax.random.normal(jax.random.PRNGKey(3), (3, 5, 7), dtype=jnp.float32)
    out3 = jax.block_until_ready(weighted_tanh(x3, scale_weight))
    assert out3.shape == x3.shape and out3.dtype == x3.dtype
    assert jnp.allclose(out3, _ref(x3), atol=1e-6, rtol=1e-6)

    print("KERNEL_OK")
</pallas_src>

<mosaic_0001>
module attributes {stable_mosaic.version = 11 : i64} {
  func.func @_weighted_tanh_kernel(%arg0: i32, %arg1: memref<1x1xf32, #tpu.memory_space<smem>>, %arg2: memref<1x2048xf32, #tpu.memory_space<vmem>>, %arg3: memref<1x2048xf32, #tpu.memory_space<vmem>>) attributes {dimension_semantics = [#tpu.dimension_semantics<parallel>], iteration_bounds = array<i64: 1>, scalar_prefetch = 0 : i64, scratch_operands = 0 : i64, tpu.core_type = #tpu.core_type<tc>, window_params = [{transform_indices = @transform_0, window_bounds = array<i64: 1, 1>}, {transform_indices = @transform_1, window_bounds = array<i64: 1, 2048>}, {transform_indices = @transform_2, window_bounds = array<i64: 1, 2048>}]} {
    %c0 = arith.constant 0 : index
    %c0_0 = arith.constant 0 : index
    %0 = vector.load %arg2[%c0, %c0_0] : memref<1x2048xf32, #tpu.memory_space<vmem>>, vector<1x2048xf32>
    %c0_1 = arith.constant 0 : index
    %c0_2 = arith.constant 0 : index
    %1 = memref.load %arg1[%c0_1, %c0_2] : memref<1x1xf32, #tpu.memory_space<smem>>
    %2 = math.tanh %0 : vector<1x2048xf32>
    %3 = vector.broadcast %1 : f32 to vector<1x2048xf32>
    %4 = arith.mulf %3, %2 : vector<1x2048xf32>
    %c0_3 = arith.constant 0 : index
    %c0_4 = arith.constant 0 : index
    %5 = vector.load %arg3[%c0_3, %c0_4] : memref<1x2048xf32, #tpu.memory_space<vmem>>, vector<1x2048xf32>
    tpu.vector_store %arg3[%c0_3, %c0_4], %4 {strides = array<i32>} : memref<1x2048xf32, #tpu.memory_space<vmem>>, vector<1x2048xf32>,
    return
  }
  func.func @transform_0(%arg0: i32) -> (i32, i32) {
    %c0_i32 = arith.constant 0 : i32
    %c0_i32_0 = arith.constant 0 : i32
    %c0_i32_1 = arith.constant 0 : i32
    return %c0_i32, %c0_i32_0 : i32, i32
  }
  func.func @transform_1(%arg0: i32) -> (i32, i32) {
    %c0_i32 = arith.constant 0 : i32
    %c0_i32_0 = arith.constant 0 : i32
    return %arg0, %c0_i32 : i32, i32
  }
  func.func @transform_2(%arg0: i32) -> (i32, i32) {
    %c0_i32 = arith.constant 0 : i32
    %c0_i32_0 = arith.constant 0 : i32
    return %arg0, %c0_i32 : i32, i32
  }
}

</mosaic_0001>

<bundles_post_ra>
// kernel: tpu_custom_call.1
= control target key start
LH: loop header
LB: loop body
LE: loop exit
PB: predicated region body
PF: predicated region fallthrough
CT: control target
= control target key end

     0   :  { %8 = vsyncpa [#allocation4], 0  ;;  %s138_s0 = inlined_call_operand.<no memory space> [shape: f32[1,1], index: 0, kind: input, shape index: {}]   ;;  %s139_s1 = inlined_call_operand.hbm [shape: f32[1,2048], index: 1, kind: input, shape index: {}]   ;;  %s140_s2 = inlined_call_operand.hbm [shape: f32[1,2048], index: 2, kind: output, shape index: {}]  }
   0x1   :  { %9 = vsyncpa [#allocation5], 0  ;;  %s17_s11 = sshll.u32 %s139_s1, 4  ;;  %s112_s12 = smov [#allocation3]   ;;  %s18_s11 = int_to_ptr.hbm [resolvable:$true] %s17_s11 }
   0x2   :  { %s19_s13 = sshll.u32 %s112_s12, 4  ;;  %s20_s13 = int_to_ptr.vmem [resolvable:$true] %s19_s13 }
   0x3   :  { %22 = dma.hbm_to_vmem [thread:$0]  %s18_s11, 256, %s20_s13, [#allocation4]  }
   0x4   :  { %108 = dma.done.wait [#allocation4], 256  }
   0x5   :  { %109 = vsyncadd [#allocation4], 4294967040  ;;  %v27_v0 = vld [vmem:[#allocation3] sm:$0xff]  ;;  %v28_v1 = vld [vmem:[#allocation3 + $0x8] sm:$0xff]  ;;  %v32_v2 = vstv %s138_s0  ;;  %s113_s16 = smov [#allocation6]   ;;  %s44_s1 = sshll.u32 %s140_s2, 4  ;;  %s45_s1 = int_to_ptr.hbm [resolvable:$true] %s44_s1 }
   0x6   :  { %56 = vtanh.f32 %v27_v0  ;;  %s42_s17 = sshll.u32 %s113_s16, 4  ;;  %s43_s17 = int_to_ptr.vmem [resolvable:$true] %s42_s17 }
   0x7   :  { %58 = vtanh.f32 %v28_v1 }
   0xc   :  { %v57_v3 = vpop.eup %56 }
   0xd   :  { %v59_v4 = vpop.eup %58  ;;  %v33_v5 = vmul.f32 %v57_v3, %v32_v2 }
   0xe   :  { %v34_v6 = vmul.f32 %v59_v4, %v32_v2 }
   0xf   :  { %35 = vst [vmem:[#allocation6] sm:$0xff] %v33_v5 }
  0x10   :  { %36 = vst [vmem:[#allocation6 + $0x8] sm:$0xff] %v34_v6 }
  0x11   :  { %47 = dma.vmem_to_hbm [thread:$0]  %s43_s17, 256, %s45_s1, [#allocation5]  }
  0x12   :  { %110 = dma.done.wait [#allocation5], 256  }
  0x13   :  { %111 = vsyncadd [#allocation5], 4294967040 }
  0x14   :  { %52 = vsyncpa [#allocation4], 1 }
  0x15   :  { %53 = vsyncpa [#allocation5], 1 }

</bundles_post_ra>
